<compile_context>
chip_gen: v6e
topology: v6e:2x2x1
jax: 0.10.0
libtpu: 0.0.40
codegen_flags: <defaults>
</compile_context>

<pallas_src>
import math

import jax
import jax.numpy as jnp
from jax.experimental import pallas as pl
from jax.experimental.pallas import tpu as pltpu


# ---------------------------------------------------------------------------
# Pallas kernel: zero-pad along the sequence axis (dim -2).
# ---------------------------------------------------------------------------
def _pad_seq_kernel(x_ref, o_ref):
    # x_ref block: (1, T,     TD)   o_ref block: (1, T_pad, TD)
    t = x_ref.shape[1]
    pad = o_ref.shape[1] - t
    o_ref[:, :t, :] = x_ref[...]
    # Zero-fill the autopad tail (small masked sublane store; lane dim stays
    # a full multiple of 128 so the bulk copy uses unmasked vst).
    o_ref[:, t:, :] = jnp.zeros((o_ref.shape[0], pad, o_ref.shape[2]), o_ref.dtype)


def _choose_lane_tile(d: int) -> int:
    """Lane-dense feature tile: multiple of 128 if possible, capped at 512 so
    double-buffered in+out blocks stay far below the v7x 64 MiB VMEM budget."""
    if d % 128 != 0:
        return d  # must take the full dim (legal: equals the array extent)
    for cand in (512, 256, 128):
        if d % cand == 0:
            return cand
    return d


def pallas_pad_seq(x: jax.Array, t_pad: int) -> jax.Array:
    """Zero-pad x (B, T, D) to (B, t_pad, D) along dim -2 via a Pallas copy."""
    b, t, d = x.shape
    assert t_pad >= t
    if t_pad == t:
        return x  # pad_to_multiple is a no-op when already aligned

    td = _choose_lane_tile(d)
    grid = (b, d // td)

    return pl.pallas_call(
        _pad_seq_kernel,
        out_shape=jax.ShapeDtypeStruct((b, t_pad, d), x.dtype),
        grid_spec=pltpu.PrefetchScalarGridSpec(
            num_scalar_prefetch=0,
            grid=grid,
            in_specs=[pl.BlockSpec((1, t, td), lambda i, j: (i, 0, j))],
            out_specs=pl.BlockSpec((1, t_pad, td), lambda i, j: (i, 0, j)),
        ),
        compiler_params=pltpu.CompilerParams(
            # Independent blocks: shard across v7x's 2 TensorCores.
            dimension_semantics=("parallel", "parallel"),
        ),
    )(x)


# ---------------------------------------------------------------------------
# LSHSA_Autopadder (JAX/Pallas)
# ---------------------------------------------------------------------------
class LSHSAAutopadderPallas:
    """JAX/Pallas analogue of LSHSA_Autopadder: pads the sequence axis up to
    2*bucket_size alignment (accounting for mem-kv / external keys), pads the
    masks to match, calls the wrapped net, and slices back to the original
    sequence length."""

    def __init__(self, net):
        self.net = net
        self.pad_dim = -2
        self.bucket_size = net.bucket_size
        self.num_mem_kv = net.num_mem_kv
        self.full_attn_thres = net.full_attn_thres

    def forward(self, x, **kwargs):
        b, t = x.shape[:2]
        m = self.num_mem_kv
        keys = kwargs.get("keys")
        input_mask = kwargs.get("input_mask")
        input_attn_mask = kwargs.get("input_attn_mask")
        k_len = 0 if keys is None else keys.shape[1]
        seqlen = t + m + k_len

        if seqlen > self.full_attn_thres:
            if input_mask is None:
                input_mask = jnp.full((b, t), True, dtype=jnp.bool_)

            multiple = self.bucket_size * 2
            # pad_to_multiple: remainder computed w.r.t. the *total* seqlen
            # (t + num_mem_kv + k_len), applied to x along dim -2.
            if seqlen % multiple == 0:
                remainder = 0
            else:
                remainder = math.ceil(seqlen / multiple) * multiple - seqlen
            t_pad = t + remainder

            # Hot path: zero-padded copy of x through the Pallas kernel.
            x = pallas_pad_seq(x, t_pad)

            # Mask padding is a tiny (B, T) boolean op; done with jnp (glue).
            new_mask = jnp.pad(
                input_mask,
                ((0, 0), (0, x.shape[1] - input_mask.shape[1])),
                constant_values=False,
            )
            kwargs.update(input_mask=new_mask)

            if input_attn_mask is not None:
                offset = x.shape[1] - input_attn_mask.shape[1]
                new_amask = jnp.pad(
                    input_attn_mask,
                    ((0, 0), (0, offset), (0, offset)),
                    constant_values=False,
                )
                kwargs.update(input_attn_mask=new_amask)

        out = self.net(x, **kwargs)
        return out[:, 0:t]

    def __call__(self, x, **kwargs):
        return self.forward(x, **kwargs)


# ---------------------------------------------------------------------------
# Demo stand-in for the wrapped reformer net.
# ---------------------------------------------------------------------------
class DemoMaskedSelfAttention:
    """Minimal deterministic stand-in for the reformer LSHSelfAttention `net`
    (exposes bucket_size / num_mem_kv / full_attn_thres and consumes the
    padded x + padded input_mask)."""

    # TODO(synk): the real LSHSelfAttention (LSH hash bucketing, mem-kv,
    # chunked attention) is an external module passed into the autopadder;
    # it is not part of LSHSA_Autopadder itself and is not re-implemented here.

    def __init__(self, bucket_size=4, num_mem_kv=1, full_attn_thres=8):
        self.bucket_size = bucket_size
        self.num_mem_kv = num_mem_kv
        self.full_attn_thres = full_attn_thres

    def __call__(self, x, input_mask=None, input_attn_mask=None, keys=None):
        b, n, d = x.shape
        scale = 1.0 / math.sqrt(d)
        logits = jnp.einsum("bid,bjd->bij", x, x) * scale
        if input_mask is not None:
            logits = jnp.where(input_mask[:, None, :], logits, -1e9)
        attn = jax.nn.softmax(logits, axis=-1)
        return jnp.einsum("bij,bjd->bid", attn, x)


if __name__ == "__main__":
    key = jax.random.PRNGKey(0)
    B, T, D = 2, 13, 128  # T deliberately not aligned to 2*bucket_size
    bucket_size, num_mem_kv, full_attn_thres = 4, 1, 8

    x = jax.random.normal(key, (B, T, D), dtype=jnp.float32)

    net = DemoMaskedSelfAttention(bucket_size, num_mem_kv, full_attn_thres)
    autopadder = LSHSAAutopadderPallas(net)

    out = jax.block_until_ready(autopadder(x))

    # Pure-JAX reference reproducing the torch module's forward.
    seqlen = T + num_mem_kv
    multiple = bucket_size * 2
    rem = 0 if seqlen % multiple == 0 else math.ceil(seqlen / multiple) * multiple - seqlen
    x_pad = jnp.pad(x, ((0, 0), (0, rem), (0, 0)))
    mask_pad = jnp.pad(
        jnp.full((B, T), True, dtype=jnp.bool_), ((0, 0), (0, rem)),
        constant_values=False,
    )
    ref = net(x_pad, input_mask=mask_pad)[:, :T]

    assert out.shape == (B, T, D)
    assert jnp.allclose(out, ref, atol=1e-5, rtol=1e-5)

    print("KERNEL_OK")
</pallas_src>

<mosaic_0001>
module attributes {stable_mosaic.version = 11 : i64} {
  func.func @_pad_seq_kernel(%arg0: i32, %arg1: i32, %arg2: memref<1x13x128xf32, #tpu.memory_space<vmem>>, %arg3: memref<1x15x128xf32, #tpu.memory_space<vmem>>) attributes {dimension_semantics = [#tpu.dimension_semantics<parallel>, #tpu.dimension_semantics<parallel>], iteration_bounds = array<i64: 2, 1>, scalar_prefetch = 0 : i64, scratch_operands = 0 : i64, tpu.core_type = #tpu.core_type<tc>, window_params = [{transform_indices = @transform_0, window_bounds = array<i64: 1, 13, 128>}, {transform_indices = @transform_1, window_bounds = array<i64: 1, 15, 128>}]} {
    %c0 = arith.constant 0 : index
    %c0_0 = arith.constant 0 : index
    %c0_1 = arith.constant 0 : index
    %0 = vector.load %arg2[%c0, %c0_0, %c0_1] : memref<1x13x128xf32, #tpu.memory_space<vmem>>, vector<1x13x128xf32>
    %c0_2 = arith.constant 0 : index
    %c0_3 = arith.constant 0 : index
    %c0_4 = arith.constant 0 : index
    %1 = vector.load %arg3[%c0_2, %c0_3, %c0_4] : memref<1x15x128xf32, #tpu.memory_space<vmem>>, vector<1x13x128xf32>
    tpu.vector_store %arg3[%c0_2, %c0_3, %c0_4], %0 {strides = array<i32>} : memref<1x15x128xf32, #tpu.memory_space<vmem>>, vector<1x13x128xf32>,
    %cst = arith.constant 0.000000e+00 : f32
    %2 = vector.broadcast %cst : f32 to vector<1x2x128xf32>
    %c0_5 = arith.constant 0 : index
    %c13 = arith.constant 13 : index
    %c0_6 = arith.constant 0 : index
    %3 = vector.load %arg3[%c0_5, %c13, %c0_6] : memref<1x15x128xf32, #tpu.memory_space<vmem>>, vector<1x2x128xf32>
    tpu.vector_store %arg3[%c0_5, %c13, %c0_6], %2 {strides = array<i32>} : memref<1x15x128xf32, #tpu.memory_space<vmem>>, vector<1x2x128xf32>,
    return
  }
  func.func @transform_0(%arg0: i32, %arg1: i32) -> (i32, i32, i32) {
    %c0_i32 = arith.constant 0 : i32
    %c0_i32_0 = arith.constant 0 : i32
    return %arg0, %c0_i32, %arg1 : i32, i32, i32
  }
  func.func @transform_1(%arg0: i32, %arg1: i32) -> (i32, i32, i32) {
    %c0_i32 = arith.constant 0 : i32
    %c0_i32_0 = arith.constant 0 : i32
    return %arg0, %c0_i32, %arg1 : i32, i32, i32
  }
}

</mosaic_0001>

<bundles_post_ra>
// kernel: tpu_custom_call.1
= control target key start
LH: loop header
LB: loop body
LE: loop exit
PB: predicated region body
PF: predicated region fallthrough
CT: control target
= control target key end

     0   :  { %s309_s6 = smov 0   ;;  %s311_s7 = smov 0   ;;  %s330_s0 = inlined_call_operand.vmem [shape: f32[2,13,128], index: 0, kind: input, shape index: {}]   ;;  %s331_s1 = inlined_call_operand.vmem [shape: f32[2,15,128], index: 1, kind: output, shape index: {}]  }
   0x1   :  { %s313_s8 = smov 0  }
   0x2 LB: > { %s23_s9 = sadd.s32 1, %s292_s7  ;;  %p240_p0 = scmp.ge.s32.totalorder %s296_s8, 1  ;;  %s296_s8 = sphi %s313_s8, %s11_s8   ;;  %s292_s7 = sphi %s311_s7, %s333_s7   ;;  %s288_s6 = sphi %s309_s6, %s332_s6  }
   0x3   : > { %p25_p1 = scmp.ge.s32.totalorder %s23_s9, 2  ;;  %p106_p2 = scmp.lt.s32.totalorder %s296_s8, 3 }
   0x5   : > { %s335_s9 = smov (%p25_p1, %s23_s9), 0  ;;  %p107_p3 = pnand %p240_p0, %p106_p2 }
   0x6   : > { %p132_p4 = scmp.lt.s32.totalorder (!%p107_p3), %s288_s6, 1 }
   0x7   : > { %110 = sbr.rel (%p107_p3) target bundleno = 17 (0x11), region = 24 }
   0xc   : > { %s337_s6 = smov (!%p132_p4, %s288_s6), 1  ;;  %v298_v2 = vmov 0.0  }
   0xd   : > { %s247_s10 = sshll.u32 %s337_s6, 4 }
   0xe   : > { %s139_s13 = scalar_lea.vmem %s330_s0, %s247_s10  ;;  %s147_s16 = scalar_lea.vmem %s331_s1, %s247_s10 }
   0xf   : > { %v148_v0 = vld [vmem:[%s139_s13] sm:$0xff]  ;;  %v149_v1 = vld [vmem:[%s139_s13 + $0x8] sm:$0x1f]  ;;  %152 = vst [vmem:[%s147_s16 + $0xd] sm:$0x3] %v298_v2 }
  0x10   : > { %150 = vst [vmem:[%s147_s16] sm:$0xff] %v148_v0  ;;  %151 = vst [vmem:[%s147_s16 + $0x8] sm:$0x1f] %v149_v1 }
  0x11 PF: > { %s11_s8 = sadd.s32 1, %s296_s8   ;;  %s332_s6 = smov %s292_s7 }
  0x12   : > { %p8_p5 = scmp.ge.s32.totalorder %s11_s8, 4   ;;  %s333_s7 = smov %s335_s9 }
  0x14   :  { %10 = sbr.rel (!%p8_p5) target bundleno = 2 (0x2), region = 54 }

</bundles_post_ra>
